<compile_context>
chip_gen: v5e
topology: v5e:2x2
jax: 0.10.0
libtpu: 0.0.40
codegen_flags: <defaults>
</compile_context>

<pallas_src>
import jax
import jax.numpy as jnp
from jax import lax
from jax.experimental import pallas as pl
from jax.experimental.pallas import tpu as pltpu


def _norm_kernel(gamma_ref, beta_ref, x_ref, o_ref):
    # x_ref: (tile_rows, D) block in VMEM; gamma/beta: (1,) scalars in SMEM.
    # NOTE: the last grid step may cover rows past the logical end of the
    # input; the math is strictly per-row, so those garbage rows never mix
    # into valid outputs (they are simply not written back by Pallas... they
    # are written but discarded outside the logical array bounds).
    x = x_ref[...]
    d = x.shape[-1]

    # Pass 1: mean (accumulate in f32 regardless of input dtype).
    s = jnp.sum(x, axis=-1, keepdims=True, dtype=jnp.float32)
    mu = s * jnp.float32(1.0 / d)

    # Pass 2 (VMEM-only, hidden under the HBM-bound DMA): centered moments.
    xc = x.astype(jnp.float32) - mu
    ssq = jnp.sum(xc * xc, axis=-1, keepdims=True)

    # torch.var default is unbiased (divides by N-1).  For d == 1 torch
    # returns NaN; reproduce that instead of crashing at trace time.
    if d > 1:
        inv_dm1 = jnp.float32(1.0 / (d - 1))
    else:
        inv_dm1 = jnp.float32(jnp.nan)
    var = ssq * inv_dm1

    inv = lax.rsqrt(var + jnp.float32(1e-8))
    scale = gamma_ref[0] * inv                      # fold gamma into the scale
    o_ref[...] = (xc * scale + beta_ref[0]).astype(o_ref.dtype)


def _round_up(n, m):
    return ((n + m - 1) // m) * m


def norm_forward(x, gamma, beta, *, tile_rows=None):
    """LayerNorm-style normalization over the last axis with scalar gamma/beta."""
    orig_shape = x.shape
    d = orig_shape[-1]
    rows = 1
    for s in orig_shape[:-1]:
        rows *= s
    x2 = x.reshape(rows, d)

    itemsize = jnp.dtype(x.dtype).itemsize
    # sublane-aligned row multiple: 8 for f32, 16 for bf16, 32 for int8
    mult = max(8, 32 // itemsize)

    # Per-generation VMEM capacity, with a platform-aware fallback
    # (v5e/v6e: 128 MiB, v7x: 64 MiB).
    try:
        vmem_cap = int(pltpu.get_tpu_info().vmem_capacity_bytes)
    except Exception:
        kind = ""
        try:
            kind = jax.devices()[0].device_kind.lower()
        except Exception:
            pass
        vmem_cap = 64 * 1024 * 1024 if "v7" in kind else 128 * 1024 * 1024

    if tile_rows is None:
        # Roofline plateaus around 4-8 MiB blocks; shrink the budget for
        # sub-32-bit dtypes because the kernel holds an f32 centered copy.
        divisor = 16 if itemsize >= 4 else 24
        block_budget = max(1 << 20, min(8 << 20, vmem_cap // divisor))
        tr = max(mult, (block_budget // max(1, d * itemsize)) // mult * mult)

        # Grid shaping: >= 2 steps (both v7x TensorCores active), prefer an
        # even step count, and re-derive the tile so blocks are evenly sized
        # (no near-empty tail block paying full per-step overhead).
        n_blocks = pl.cdiv(rows, tr)
        if n_blocks < 2 and rows > mult:
            n_blocks = 2
        elif n_blocks > 1 and n_blocks % 2 == 1:
            n_blocks += 1
        tile_rows = max(mult, _round_up(pl.cdiv(rows, n_blocks), mult))
    else:
        tile_rows = max(mult, _round_up(int(tile_rows), mult))

    grid = pl.cdiv(rows, tile_rows)

    # VMEM needed per grid step: 2x double-buffered input + 2x output blocks
    # in native dtype, plus ~3 f32-sized in-kernel temporaries (xc, xc*xc,
    # pre-cast result).  Keep comfortably under physical VMEM on all chips.
    block_bytes = tile_rows * d * itemsize
    f32_block = tile_rows * d * 4
    need = 4 * block_bytes + 3 * f32_block
    vmem_limit = int(min(vmem_cap * 3 // 4, max(32 << 20, need)))

    gamma_arr = jnp.asarray(gamma, jnp.float32).reshape(1)
    beta_arr = jnp.asarray(beta, jnp.float32).reshape(1)

    cost = pl.CostEstimate(
        flops=7 * rows * d,
        transcendentals=rows,
        bytes_accessed=2 * rows * d * itemsize,
    )

    out = pl.pallas_call(
        _norm_kernel,
        out_shape=jax.ShapeDtypeStruct((rows, d), x.dtype),
        grid_spec=pltpu.PrefetchScalarGridSpec(
            num_scalar_prefetch=0,
            grid=(grid,),
            in_specs=[
                pl.BlockSpec(memory_space=pltpu.MemorySpace.SMEM),  # gamma
                pl.BlockSpec(memory_space=pltpu.MemorySpace.SMEM),  # beta
                pl.BlockSpec((tile_rows, d), lambda i: (i, 0)),
            ],
            out_specs=pl.BlockSpec((tile_rows, d), lambda i: (i, 0)),
        ),
        compiler_params=pltpu.CompilerParams(
            dimension_semantics=("parallel",),
            vmem_limit_bytes=vmem_limit,
        ),
        cost_estimate=cost,
    )(gamma_arr, beta_arr, x2)

    return out.reshape(orig_shape)


if __name__ == "__main__":
    key = jax.random.PRNGKey(0)
    # small shape consistent with the forward: normalize over the last axis
    x = jax.random.normal(key, (2, 8, 128), dtype=jnp.float32)

    # deterministic parameter init matching torch: gamma=1.0, beta=0.0
    gamma = jnp.float32(1.0)
    beta = jnp.float32(0.0)

    out = norm_forward(x, gamma, beta)
    out = jax.block_until_ready(out)

    # reference check in plain JAX (unbiased variance, eps=1e-8 added to var)
    mu = jnp.mean(x, axis=-1, keepdims=True)
    var = jnp.sum((x - mu) ** 2, axis=-1, keepdims=True) / (x.shape[-1] - 1)
    ref = gamma * (x - mu) / jnp.sqrt(var + 1e-8) + beta
    assert jnp.max(jnp.abs(out - ref)) < 1e-4

    print("KERNEL_OK")
</pallas_src>

<mosaic_0001>
module attributes {stable_mosaic.version = 11 : i64} {
  func.func @_norm_kernel(%arg0: i32, %arg1: memref<1xf32, #tpu.memory_space<smem>>, %arg2: memref<1xf32, #tpu.memory_space<smem>>, %arg3: memref<8x128xf32, #tpu.memory_space<vmem>>, %arg4: memref<8x128xf32, #tpu.memory_space<vmem>>) attributes {dimension_semantics = [#tpu.dimension_semantics<parallel>], iteration_bounds = array<i64: 2>, scalar_prefetch = 0 : i64, scratch_operands = 0 : i64, tpu.core_type = #tpu.core_type<tc>, window_params = [{transform_indices = @transform_0, window_bounds = array<i64: 1>}, {transform_indices = @transform_1, window_bounds = array<i64: 1>}, {transform_indices = @transform_2, window_bounds = array<i64: 8, 128>}, {transform_indices = @transform_3, window_bounds = array<i64: 8, 128>}]} {
    %c0 = arith.constant 0 : index
    %c0_0 = arith.constant 0 : index
    %0 = vector.load %arg3[%c0, %c0_0] : memref<8x128xf32, #tpu.memory_space<vmem>>, vector<8x128xf32>
    %cst = arith.constant dense<0.000000e+00> : vector<8xf32>
    %1 = vector.multi_reduction <add>, %0, %cst [1] : vector<8x128xf32> to vector<8xf32>
    %2 = vector.shape_cast %1 : vector<8xf32> to vector<8x1xf32>
    %cst_1 = arith.constant 7.812500e-03 : f32
    %3 = vector.broadcast %cst_1 : f32 to vector<8x1xf32>
    %4 = arith.mulf %2, %3 : vector<8x1xf32>
    %5 = vector.broadcast %4 : vector<8x1xf32> to vector<8x128xf32>
    %6 = arith.subf %0, %5 : vector<8x128xf32>
    %7 = arith.mulf %6, %6 : vector<8x128xf32>
    %cst_2 = arith.constant dense<0.000000e+00> : vector<8xf32>
    %8 = vector.multi_reduction <add>, %7, %cst_2 [1] : vector<8x128xf32> to vector<8xf32>
    %9 = vector.shape_cast %8 : vector<8xf32> to vector<8x1xf32>
    %cst_3 = arith.constant 0.00787401571 : f32
    %10 = vector.broadcast %cst_3 : f32 to vector<8x1xf32>
    %11 = arith.mulf %9, %10 : vector<8x1xf32>
    %cst_4 = arith.constant 9.99999993E-9 : f32
    %12 = vector.broadcast %cst_4 : f32 to vector<8x1xf32>
    %13 = arith.addf %11, %12 : vector<8x1xf32>
    %14 = math.rsqrt %13 : vector<8x1xf32>
    %c0_5 = arith.constant 0 : index
    %15 = memref.load %arg1[%c0_5] : memref<1xf32, #tpu.memory_space<smem>>
    %16 = vector.broadcast %15 : f32 to vector<8x1xf32>
    %17 = arith.mulf %16, %14 : vector<8x1xf32>
    %18 = vector.broadcast %17 : vector<8x1xf32> to vector<8x128xf32>
    %19 = arith.mulf %6, %18 : vector<8x128xf32>
    %c0_6 = arith.constant 0 : index
    %20 = memref.load %arg2[%c0_6] : memref<1xf32, #tpu.memory_space<smem>>
    %21 = vector.broadcast %20 : f32 to vector<8x128xf32>
    %22 = arith.addf %19, %21 : vector<8x128xf32>
    %c0_7 = arith.constant 0 : index
    %c0_8 = arith.constant 0 : index
    %23 = vector.load %arg4[%c0_7, %c0_8] : memref<8x128xf32, #tpu.memory_space<vmem>>, vector<8x128xf32>
    tpu.vector_store %arg4[%c0_7, %c0_8], %22 {strides = array<i32>} : memref<8x128xf32, #tpu.memory_space<vmem>>, vector<8x128xf32>,
    return
  }
  func.func @transform_0(%arg0: i32) -> i32 {
    %c0_i32 = arith.constant 0 : i32
    %c0_i32_0 = arith.constant 0 : i32
    return %c0_i32 : i32
  }
  func.func @transform_1(%arg0: i32) -> i32 {
    %c0_i32 = arith.constant 0 : i32
    %c0_i32_0 = arith.constant 0 : i32
    return %c0_i32 : i32
  }
  func.func @transform_2(%arg0: i32) -> (i32, i32) {
    %c0_i32 = arith.constant 0 : i32
    %c0_i32_0 = arith.constant 0 : i32
    return %arg0, %c0_i32 : i32, i32
  }
  func.func @transform_3(%arg0: i32) -> (i32, i32) {
    %c0_i32 = arith.constant 0 : i32
    %c0_i32_0 = arith.constant 0 : i32
    return %arg0, %c0_i32 : i32, i32
  }
}

</mosaic_0001>

<bundles_post_ra>
// kernel: tpu_custom_call.1
= control target key start
LH: loop header
LB: loop body
LE: loop exit
PB: predicated region body
PF: predicated region fallthrough
CT: control target
= control target key end

     0   :  { %s619_s0 = inlined_call_operand.<no memory space> [shape: f32[1], index: 0, kind: input, shape index: {}]   ;;  %s620_s1 = inlined_call_operand.<no memory space> [shape: f32[1], index: 1, kind: input, shape index: {}]   ;;  %s621_s2 = inlined_call_operand.hbm [shape: f32[16,128], index: 2, kind: input, shape index: {}]   ;;  %s622_s3 = inlined_call_operand.hbm [shape: f32[16,128], index: 3, kind: output, shape index: {}]  }
   0x1   :  { %8 = sst [smem:[#allocation2]] %s619_s0 }
   0x2   :  { %9 = sst [smem:[#allocation3]] %s620_s1 }
   0x3   :  { %10 = vsyncpa [#allocation5], 0 }
   0x4   :  { %12 = vsyncpa [#allocation5 + $0x1], 0 }
   0x5   :  { %13 = vsyncpa [#allocation6], 0 }
   0x6   :  { %15 = vsyncpa [#allocation6 + $0x1], 0  ;;  %s488_s16 = smov 0   ;;  %s490_s17 = smov 0  }
   0x7   :  { %s492_s18 = smov 0   ;;  %s494_s19 = smov 0  }
   0x8 LB: > { %s509_s0 = sadd.s32 4294967295, %s460_s19   ;;  %s304_s1 = sadd.s32 4294967294, %s460_s19   ;;  %s460_s19 = sphi %s494_s19, %s632_s19   ;;  %s456_s18 = sphi %s492_s18, %s631_s18   ;;  %s452_s17 = sphi %s490_s17, %s630_s17   ;;  %s448_s16 = sphi %s488_s16, %s629_s16  }
   0x9   : > { %s513_s20 = sadd.s32 1, %s460_s19   ;;  %s70_s21 = sadd.s32 1, %s456_s18 }
   0xa   : > { %s67_s22 = ssub.s32 %s460_s19, %s513_s20  ;;  %p77_p0 = scmp.ne.s32.totalorder %s456_s18, %s452_s17 }
   0xb   : > { %p68_p1 = scmp.eq.s32.totalorder %s67_s22, 0  ;;  %p78_p2 = scmp.eq.s32.totalorder %s460_s19, 0 }
   0xc   : > { %p83_p3 = scmp.ne.s32.totalorder %s452_s17, %s448_s16  ;;  %p84_p4 = scmp.eq.s32.totalorder %s509_s0, 0 }
   0xd   : > { %s525_s23 = scalar_select %p68_p1, %s456_s18, %s70_s21  }
   0xe   : > { %p527_p5 = por %p78_p2, %p77_p0  ;;  %p531_p6 = por %p84_p4, %p83_p3 }
   0xf   : > { %p107_p7 = scmp.eq.s32.totalorder %s509_s0, 1  ;;  %p113_p8 = scmp.eq.s32.totalorder %s304_s1, 1 }
  0x10   : > { %p328_p10 = scmp.lt.s32.totalorder %s460_s19, 2  ;;  %s139_s28 = sand.u32 1, %s456_s18  }
  0x11   : > { %p538_p11 = por %p107_p7, %p77_p0  ;;  %p542_p12 = por %p113_p8, %p83_p3 }
  0x12   : > { %s308_s29 = sshll.u32 %s460_s19, 3  ;;  %s307_s30 = sshll.u32 %s139_s28, 3 }
  0x13   : > { %s147_s6 = scalar_lea.hbm %s621_s2, %s308_s29  ;;  %s143_s8 = scalar_lea.vmem [#allocation4], %s307_s30 }
  0x14   : > { %s149_s7 = sshll.u32 %s147_s6, 4  ;;  %s151_s9 = sshll.u32 %s143_s8, 4  ;;  %s150_s7 = int_to_ptr.hbm [resolvable:$true] %s149_s7  ;;  %s152_s9 = int_to_ptr.vmem [resolvable:$true] %s151_s9 }
  0x15   : > { %p553_p13 = pnand %p328_p10, %p527_p5  ;;  %p309_p0 = scmp.ge.s32.totalorder %s460_s19, 1 }
  0x16   : > { %p156_p1 = scmp.lt.s32.totalorder %s460_s19, 3  ;;  %s140_s11 = scalar_lea.sflag [#allocation5], %s139_s28 }
  0x17   : > { %s364_s12 = sshra.s32 %s150_s7, 4  ;;  %p368_p3 = pneg %p553_p13  ;;  %s365_s12 = int_to_ptr.hbm [resolvable:$true] %s364_s12 }
  0x18   : > { %s366_s13 = scalar_lea.hbm %s365_s12, 8  ;;  %s371_s1 = scalar_lea.hbm %s621_s2, 16 }
  0x19   : > { %p367_p2 = scmp.ne.s32.totalorder %s365_s12, %s366_s13  ;;  %p372_p5 = scmp.lt.s32.totalorder %s365_s12, %s621_s2 }
  0x1a   : > { %p373_p8 = scmp.lt.s32.totalorder %s371_s1, %s366_s13 }
  0x1b   : > { %p369_p4 = pnand %p368_p3, %p367_p2 }
  0x1c   : > { %p374_p10 = por %p373_p8, %p372_p5 }
  0x1d   : > { %p370_p7 = pneg %p369_p4 }
  0x1f   : > { %p375_p9 = pnand %p374_p10, %p370_p7 }
  0x21   : > { %378 = shalt.err (!%p375_p9)
}
  0x22   : > { %323 = dma.hbm_to_vmem [thread:$0]  (!%p553_p13), %s150_s7, 128, %s152_s9, %s140_s11  }
  0x23   : > { %p157_p2 = pnand %p309_p0, %p156_p1 }
  0x24   : > { %s574_s24 = sand.u32 (!%p157_p2), 1, %s452_s17  }
  0x25   : > { %160 = sbr.rel (%p157_p2) target bundleno = 313 (0x139), region = 32  ;;  %s310_s28 = sshll.u32 (!%p157_p2), %s574_s24, 3 }
  0x26   : > { %s163_s29 = scalar_lea.sflag (!%p157_p2), [#allocation5], %s574_s24  ;;  %s166_s30 = scalar_lea.vmem (!%p157_p2), [#allocation4], %s310_s28 }
  0x2a   : > { %439 = dma.done.wait (%p531_p6), %s163_s29, 128  }
  0x2b   : > { %441 = vsyncadd (%p531_p6), %s163_s29, 4294967168  ;;  %v190_v0 = vld [vmem:[%s166_s30] sm:$0xff]  ;;  %s210_s4 = sld [smem:[#allocation2]]  ;;  %s313_s25 = sshll.u32 %s509_s0, 3 }
  0x2c   : > { %191 = vadd.xlane.f32.xlu0 %v190_v0  ;;  %s214_s5 = sld [smem:[#allocation3]]  ;;  %s229_s8 = scalar_lea.hbm %s622_s3, %s313_s25 }
  0x2d   : > { %s189_s9 = scalar_lea.vmem [#allocation7], %s310_s28  ;;  %s233_s11 = sshll.u32 %s229_s8, 4  ;;  %s234_s11 = int_to_ptr.hbm [resolvable:$true] %s233_s11 }
  0x2e   : > { %s231_s10 = sshll.u32 %s189_s9, 4  ;;  %s219_s0 = scalar_lea.sflag [#allocation6], %s574_s24  ;;  %s232_s10 = int_to_ptr.vmem [resolvable:$true] %s231_s10 }
  0x2f   : > { %s408_s12 = sshra.s32 %s234_s11, 4  ;;  %s414_s1 = scalar_lea.hbm %s622_s3, 16  ;;  %s409_s12 = int_to_ptr.hbm [resolvable:$true] %s408_s12 }
  0x30   : > { %s410_s13 = scalar_lea.hbm %s409_s12, 8  ;;  %p415_p0 = scmp.lt.s32.totalorder %s409_s12, %s622_s3 }
  0x31   : > { %v211_v13 = vstv %s210_s4  ;;  %p411_p6 = scmp.ne.s32.totalorder %s409_s12, %s410_s13  ;;  %p416_p1 = scmp.lt.s32.totalorder %s414_s1, %s410_s13 }
  0x32   : > { %v215_v17 = vstv %s214_s5 }
  0x33   : > { %p412_p9 = pnand %p411_p6, %p538_p11  ;;  %p417_p3 = por %p416_p1, %p415_p0 }
  0x35   : > { %p413_p13 = pneg %p412_p9 }
  0x37   : > { %p418_p4 = pnand %p417_p3, %p413_p13 }
  0x9f   : > { %v192_v1 = vpop.xlane.xlu0 %191 }
  0xa0   : > { %v193_v2 = vmul.f32 0.0078125, %v192_v1 }
  0xa2   : > { %v194_v3 = vsub.f32 %v190_v0, %v193_v2 }
  0xa4   : > { %v195_v4 = vmul.f32 %v194_v3, %v194_v3 }
  0xa6   : > { %196 = vadd.xlane.f32.xlu0 %v195_v4 }
 0x119   : > { %v197_v5 = vpop.xlane.xlu0 %196 }
 0x11a   : > { %v198_v6 = vmul.f32 0.007874016, %v197_v5 }
 0x11c   : > { %v199_v7 = vadd.f32 1e-08, %v198_v6 }
 0x11e   : > { %362 = vrsqrt.f32 %v199_v7  ;;  %vm206_vm1 = vweird.f32 %v199_v7 }
 0x124   : > { %v363_v8 = vpop.eup %362 }
 0x125   : > { %v201_v9 = vmul.f32 %v363_v8, %v199_v7  ;;  %vm207_vm0 = vweird.f32 %v363_v8 }
 0x126   : > { %vm208_vm2 = vmor %vm206_vm1, %vm207_vm0 }
 0x127   : > { %v202_v10 = vmul.f32 %v363_v8, %v201_v9 }
 0x129   : > { %v203_v11 = vmul.f32 0.5, %v202_v10 }
 0x12b   : > { %v204_v12 = vsub.f32 1.5, %v203_v11 }
 0x12d   : > { %v205_v14 = vmul.f32 %v363_v8, %v204_v12 }
 0x12f   : > { %v209_v15 = vsel %vm208_vm2, %v363_v8, %v205_v14 }
 0x130   : > { %v212_v16 = vmul.f32 %v211_v13, %v209_v15 }
 0x132   : > { %v213_v18 = vmul.f32 %v212_v16, %v194_v3 }
 0x134   : > { %v216_v19 = vadd.f32 %v215_v17, %v213_v18 }
 0x136   : > { %217 = vst [vmem:[%s189_s9] sm:$0xff] %v216_v19 }
 0x137   : > { %421 = shalt.err (!%p418_p4)
}
 0x138   : > { %318 = dma.vmem_to_hbm [thread:$0]  (%p538_p11), %s232_s10, 128, %s234_s11, %s219_s0  }
 0x139 PF: > { %s245_s24 = sand.u32 1, %s448_s16   ;;  %p628_p7 = scmp.ge.s32.totalorder %s460_s19, 2 }
 0x13a   : > { %s246_s28 = scalar_lea.sflag [#allocation6], %s245_s24 }
 0x13b   : > { %p325_p5 = pnand %p628_p7, %p542_p12 }
 0x13d   : > { %p326_p8 = pneg %p325_p5 }
 0x13f   : > { %443 = dma.done.wait (%p326_p8), %s246_s28, 128  }
 0x140   : > { %445 = vsyncadd (%p326_p8), %s246_s28, 4294967168  ;;  %p18_p10 = scmp.ge.s32.totalorder %s513_s20, 4   ;;  %s629_s16 = smov %s452_s17 }
 0x141   : > { %s630_s17 = smov %s456_s18  ;;  %s631_s18 = smov %s525_s23 }
 0x142   : > { %s632_s19 = smov %s513_s20  ;;  %20 = sbr.rel (!%p18_p10) target bundleno = 8 (0x8), region = 77 }
 0x147   :  { %252 = vsyncpa [#allocation5], 1 }
 0x148   :  { %254 = vsyncpa [#allocation5 + $0x1], 1 }
 0x149   :  { %255 = vsyncpa [#allocation6], 1 }
 0x14a   :  { %257 = vsyncpa [#allocation6 + $0x1], 1 }

</bundles_post_ra>
